<compile_context>
chip_gen: v7x
topology: tpu7x:2x2x1
jax: 0.10.0
libtpu: 0.0.40
codegen_flags: <defaults>
</compile_context>

<pallas_src>
import jax
import jax.numpy as jnp
from jax.experimental import pallas as pl
from jax.experimental.pallas import tpu as pltpu


def gru_seq_kernel(x2d_ref, w_ih_ref, w_hh_ref, h0_ref, h_out_ref):
    """Full GRU sequence in a single kernel invocation.

    x2d_ref  : (S*B, I)  inputs for all timesteps, flattened over (seq, batch)
    w_ih_ref : (I, 3H)   fused, transposed input weights, column order [r | z | n]
    w_hh_ref : (H, 3H)   fused, transposed hidden weights, column order [r | z | n]
    h0_ref   : (1, B, H) initial hidden state
    h_out_ref: (1, B, H) final hidden state
    """
    B = h0_ref.shape[1]
    H = h0_ref.shape[2]
    S = x2d_ref.shape[0] // B

    # Prologue: one fused input projection for every timestep (off the serial path).
    gx_all = jnp.dot(x2d_ref[...].astype(jnp.float32), w_ih_ref[...],
                     preferred_element_type=jnp.float32)               # (S*B, 3H)

    w_hh = w_hh_ref[...]                                               # (H, 3H), resident
    h = h0_ref[0].astype(jnp.float32)                                  # (B, H)

    # Serial recurrence, fully unrolled (S is small and static); row slices are
    # B-row (sublane-tile) aligned static slices of gx_all.
    for t in range(S):
        gx = gx_all[t * B:(t + 1) * B, :]                              # (B, 3H)
        gh = jnp.dot(h, w_hh, preferred_element_type=jnp.float32)      # (B, 3H)
        # One fused sigmoid over the contiguous [r | z] lanes.
        rz = jax.nn.sigmoid(gx[:, 0:2 * H] + gh[:, 0:2 * H])           # (B, 2H)
        r = rz[:, 0:H]
        z = rz[:, H:2 * H]
        n = jnp.tanh(gx[:, 2 * H:3 * H] + r * gh[:, 2 * H:3 * H])      # (B, H)
        h = n + z * (h - n)                                            # == (1-z)*n + z*h

    h_out_ref[...] = h[None].astype(h_out_ref.dtype)


def update_function_gru(m_v, h_v, w_ih, w_hh):
    """UpdateFunction('gru') forward (num_layers=1, bias=False): returns final hidden state.

    m_v : (S, B, I), h_v : (1, B, H)
    w_ih: (3H, I) PyTorch weight_ih_l0, gate order [r, z, n]
    w_hh: (3H, H) PyTorch weight_hh_l0, gate order [r, z, n]
    """
    S, B, I = m_v.shape
    H = h_v.shape[-1]

    # Fuse + transpose gate weights so the kernel does (., 3H) matmuls (gate axis last).
    w_ih_f = w_ih.T          # (I, 3H)
    w_hh_f = w_hh.T          # (H, 3H)
    # Flatten (seq, batch) so the hoisted input projection is one 2-D matmul in-kernel.
    x2d = m_v.reshape(S * B, I)

    vmem = pl.BlockSpec(memory_space=pltpu.MemorySpace.VMEM)
    return pl.pallas_call(
        gru_seq_kernel,
        out_shape=jax.ShapeDtypeStruct((1, B, H), m_v.dtype),
        in_specs=[vmem, vmem, vmem, vmem],
        out_specs=vmem,
    )(x2d, w_ih_f, w_hh_f, h_v)


def gru_reference(m_v, h_v, w_ih, w_hh):
    """Pure-JAX reference (PyTorch GRU, bias=False, 1 layer)."""
    H = h_v.shape[-1]
    wir, wiz, win = w_ih[0:H], w_ih[H:2 * H], w_ih[2 * H:3 * H]
    whr, whz, whn = w_hh[0:H], w_hh[H:2 * H], w_hh[2 * H:3 * H]

    def step(h, x):
        r = jax.nn.sigmoid(x @ wir.T + h @ whr.T)
        z = jax.nn.sigmoid(x @ wiz.T + h @ whz.T)
        n = jnp.tanh(x @ win.T + r * (h @ whn.T))
        return n + z * (h - n), None

    h_last, _ = jax.lax.scan(step, h_v[0], m_v)
    return h_last[None]


if __name__ == "__main__":
    # args = {'node_feature_size': 32, 'message_size': 32}  -> GRU(32, 32, bias=False)
    S, B, I, H = 8, 8, 32, 32

    key = jax.random.PRNGKey(0)
    k1, k2, k3, k4 = jax.random.split(key, 4)

    m_v = jax.random.normal(k1, (S, B, I), dtype=jnp.float32)
    h_v = jax.random.normal(k2, (1, B, H), dtype=jnp.float32)

    # Deterministic PyTorch-style init: U(-1/sqrt(H), 1/sqrt(H))
    bound = 1.0 / jnp.sqrt(jnp.float32(H))
    w_ih = jax.random.uniform(k3, (3 * H, I), minval=-bound, maxval=bound, dtype=jnp.float32)
    w_hh = jax.random.uniform(k4, (3 * H, H), minval=-bound, maxval=bound, dtype=jnp.float32)

    h_kernel = jax.block_until_ready(update_function_gru(m_v, h_v, w_ih, w_hh))
    h_ref = gru_reference(m_v, h_v, w_ih, w_hh)

    assert h_kernel.shape == (1, B, H)
    assert jnp.allclose(h_kernel, h_ref, rtol=1e-5, atol=1e-5), "mismatch vs reference"

    print("KERNEL_OK")
</pallas_src>

<mosaic_0001>
module attributes {stable_mosaic.version = 11 : i64} {
  func.func @gru_seq_kernel(%arg0: memref<64x32xf32, #tpu.memory_space<vmem>>, %arg1: memref<32x96xf32, #tpu.memory_space<vmem>>, %arg2: memref<32x96xf32, #tpu.memory_space<vmem>>, %arg3: memref<1x8x32xf32, #tpu.memory_space<vmem>>, %arg4: memref<1x8x32xf32, #tpu.memory_space<vmem>>) attributes {dimension_semantics = [], scalar_prefetch = 0 : i64, scratch_operands = 0 : i64, tpu.core_type = #tpu.core_type<tc>} {
    %c0 = arith.constant 0 : index
    %c0_0 = arith.constant 0 : index
    %0 = vector.load %arg0[%c0, %c0_0] : memref<64x32xf32, #tpu.memory_space<vmem>>, vector<64x32xf32>
    %c0_1 = arith.constant 0 : index
    %c0_2 = arith.constant 0 : index
    %1 = vector.load %arg1[%c0_1, %c0_2] : memref<32x96xf32, #tpu.memory_space<vmem>>, vector<32x96xf32>
    %cst = arith.constant dense<0.000000e+00> : vector<64x96xf32>
    %2 = tpu.matmul %0, %1, %cst {dimension_numbers = #tpu.dot_dimension_numbers<[1], [0], [0], [1], [0, 0, 1, 1], [], []>} : vector<64x32xf32>, vector<32x96xf32>, vector<64x96xf32> -> vector<64x96xf32>
    %c0_3 = arith.constant 0 : index
    %c0_4 = arith.constant 0 : index
    %3 = vector.load %arg2[%c0_3, %c0_4] : memref<32x96xf32, #tpu.memory_space<vmem>>, vector<32x96xf32>
    %c0_5 = arith.constant 0 : index
    %c0_6 = arith.constant 0 : index
    %c0_7 = arith.constant 0 : index
    %4 = vector.load %arg3[%c0_5, %c0_6, %c0_7] : memref<1x8x32xf32, #tpu.memory_space<vmem>>, vector<1x8x32xf32>
    %5 = vector.shape_cast %4 : vector<1x8x32xf32> to vector<8x32xf32>
    %6 = vector.extract_strided_slice %2 {offsets = [0, 0], sizes = [8, 96], strides = [1, 1]} : vector<64x96xf32> to vector<8x96xf32>
    %cst_8 = arith.constant dense<0.000000e+00> : vector<8x96xf32>
    %7 = tpu.matmul %5, %3, %cst_8 {dimension_numbers = #tpu.dot_dimension_numbers<[1], [0], [0], [1], [0, 0, 1, 1], [], []>} : vector<8x32xf32>, vector<32x96xf32>, vector<8x96xf32> -> vector<8x96xf32>
    %8 = vector.extract_strided_slice %6 {offsets = [0, 0], sizes = [8, 64], strides = [1, 1]} : vector<8x96xf32> to vector<8x64xf32>
    %9 = vector.extract_strided_slice %7 {offsets = [0, 0], sizes = [8, 64], strides = [1, 1]} : vector<8x96xf32> to vector<8x64xf32>
    %10 = arith.addf %8, %9 : vector<8x64xf32>
    %11 = arith.negf %10 : vector<8x64xf32>
    %12 = math.exp %11 : vector<8x64xf32>
    %cst_9 = arith.constant 1.000000e+00 : f32
    %13 = vector.broadcast %cst_9 : f32 to vector<8x64xf32>
    %14 = arith.addf %13, %12 : vector<8x64xf32>
    %15 = arith.divf %13, %14 : vector<8x64xf32>
    %16 = vector.extract_strided_slice %15 {offsets = [0, 0], sizes = [8, 32], strides = [1, 1]} : vector<8x64xf32> to vector<8x32xf32>
    %17 = vector.extract_strided_slice %15 {offsets = [0, 32], sizes = [8, 32], strides = [1, 1]} : vector<8x64xf32> to vector<8x32xf32>
    %18 = vector.extract_strided_slice %6 {offsets = [0, 64], sizes = [8, 32], strides = [1, 1]} : vector<8x96xf32> to vector<8x32xf32>
    %19 = vector.extract_strided_slice %7 {offsets = [0, 64], sizes = [8, 32], strides = [1, 1]} : vector<8x96xf32> to vector<8x32xf32>
    %20 = arith.mulf %16, %19 : vector<8x32xf32>
    %21 = arith.addf %18, %20 : vector<8x32xf32>
    %22 = math.tanh %21 : vector<8x32xf32>
    %23 = arith.subf %5, %22 : vector<8x32xf32>
    %24 = arith.mulf %17, %23 : vector<8x32xf32>
    %25 = arith.addf %22, %24 : vector<8x32xf32>
    %26 = vector.extract_strided_slice %2 {offsets = [8, 0], sizes = [8, 96], strides = [1, 1]} : vector<64x96xf32> to vector<8x96xf32>
    %cst_10 = arith.constant dense<0.000000e+00> : vector<8x96xf32>
    %27 = tpu.matmul %25, %3, %cst_10 {dimension_numbers = #tpu.dot_dimension_numbers<[1], [0], [0], [1], [0, 0, 1, 1], [], []>} : vector<8x32xf32>, vector<32x96xf32>, vector<8x96xf32> -> vector<8x96xf32>
    %28 = vector.extract_strided_slice %26 {offsets = [0, 0], sizes = [8, 64], strides = [1, 1]} : vector<8x96xf32> to vector<8x64xf32>
    %29 = vector.extract_strided_slice %27 {offsets = [0, 0], sizes = [8, 64], strides = [1, 1]} : vector<8x96xf32> to vector<8x64xf32>
    %30 = arith.addf %28, %29 : vector<8x64xf32>
    %31 = arith.negf %30 : vector<8x64xf32>
    %32 = math.exp %31 : vector<8x64xf32>
    %cst_11 = arith.constant 1.000000e+00 : f32
    %33 = vector.broadcast %cst_11 : f32 to vector<8x64xf32>
    %34 = arith.addf %33, %32 : vector<8x64xf32>
    %35 = arith.divf %33, %34 : vector<8x64xf32>
    %36 = vector.extract_strided_slice %35 {offsets = [0, 0], sizes = [8, 32], strides = [1, 1]} : vector<8x64xf32> to vector<8x32xf32>
    %37 = vector.extract_strided_slice %35 {offsets = [0, 32], sizes = [8, 32], strides = [1, 1]} : vector<8x64xf32> to vector<8x32xf32>
    %38 = vector.extract_strided_slice %26 {offsets = [0, 64], sizes = [8, 32], strides = [1, 1]} : vector<8x96xf32> to vector<8x32xf32>
    %39 = vector.extract_strided_slice %27 {offsets = [0, 64], sizes = [8, 32], strides = [1, 1]} : vector<8x96xf32> to vector<8x32xf32>
    %40 = arith.mulf %36, %39 : vector<8x32xf32>
    %41 = arith.addf %38, %40 : vector<8x32xf32>
    %42 = math.tanh %41 : vector<8x32xf32>
    %43 = arith.subf %25, %42 : vector<8x32xf32>
    %44 = arith.mulf %37, %43 : vector<8x32xf32>
    %45 = arith.addf %42, %44 : vector<8x32xf32>
    %46 = vector.extract_strided_slice %2 {offsets = [16, 0], sizes = [8, 96], strides = [1, 1]} : vector<64x96xf32> to vector<8x96xf32>
    %cst_12 = arith.constant dense<0.000000e+00> : vector<8x96xf32>
    %47 = tpu.matmul %45, %3, %cst_12 {dimension_numbers = #tpu.dot_dimension_numbers<[1], [0], [0], [1], [0, 0, 1, 1], [], []>} : vector<8x32xf32>, vector<32x96xf32>, vector<8x96xf32> -> vector<8x96xf32>
    %48 = vector.extract_strided_slice %46 {offsets = [0, 0], sizes = [8, 64], strides = [1, 1]} : vector<8x96xf32> to vector<8x64xf32>
    %49 = vector.extract_strided_slice %47 {offsets = [0, 0], sizes = [8, 64], strides = [1, 1]} : vector<8x96xf32> to vector<8x64xf32>
    %50 = arith.addf %48, %49 : vector<8x64xf32>
    %51 = arith.negf %50 : vector<8x64xf32>
    %52 = math.exp %51 : vector<8x64xf32>
    %cst_13 = arith.constant 1.000000e+00 : f32
    %53 = vector.broadcast %cst_13 : f32 to vector<8x64xf32>
    %54 = arith.addf %53, %52 : vector<8x64xf32>
    %55 = arith.divf %53, %54 : vector<8x64xf32>
    %56 = vector.extract_strided_slice %55 {offsets = [0, 0], sizes = [8, 32], strides = [1, 1]} : vector<8x64xf32> to vector<8x32xf32>
    %57 = vector.extract_strided_slice %55 {offsets = [0, 32], sizes = [8, 32], strides = [1, 1]} : vector<8x64xf32> to vector<8x32xf32>
    %58 = vector.extract_strided_slice %46 {offsets = [0, 64], sizes = [8, 32], strides = [1, 1]} : vector<8x96xf32> to vector<8x32xf32>
    %59 = vector.extract_strided_slice %47 {offsets = [0, 64], sizes = [8, 32], strides = [1, 1]} : vector<8x96xf32> to vector<8x32xf32>
    %60 = arith.mulf %56, %59 : vector<8x32xf32>
    %61 = arith.addf %58, %60 : vector<8x32xf32>
    %62 = math.tanh %61 : vector<8x32xf32>
    %63 = arith.subf %45, %62 : vector<8x32xf32>
    %64 = arith.mulf %57, %63 : vector<8x32xf32>
    %65 = arith.addf %62, %64 : vector<8x32xf32>
    %66 = vector.extract_strided_slice %2 {offsets = [24, 0], sizes = [8, 96], strides = [1, 1]} : vector<64x96xf32> to vector<8x96xf32>
    %cst_14 = arith.constant dense<0.000000e+00> : vector<8x96xf32>
    %67 = tpu.matmul %65, %3, %cst_14 {dimension_numbers = #tpu.dot_dimension_numbers<[1], [0], [0], [1], [0, 0, 1, 1], [], []>} : vector<8x32xf32>, vector<32x96xf32>, vector<8x96xf32> -> vector<8x96xf32>
    %68 = vector.extract_strided_slice %66 {offsets = [0, 0], sizes = [8, 64], strides = [1, 1]} : vector<8x96xf32> to vector<8x64xf32>
    %69 = vector.extract_strided_slice %67 {offsets = [0, 0], sizes = [8, 64], strides = [1, 1]} : vector<8x96xf32> to vector<8x64xf32>
    %70 = arith.addf %68, %69 : vector<8x64xf32>
    %71 = arith.negf %70 : vector<8x64xf32>
    %72 = math.exp %71 : vector<8x64xf32>
    %cst_15 = arith.constant 1.000000e+00 : f32
    %73 = vector.broadcast %cst_15 : f32 to vector<8x64xf32>
    %74 = arith.addf %73, %72 : vector<8x64xf32>
    %75 = arith.divf %73, %74 : vector<8x64xf32>
    %76 = vector.extract_strided_slice %75 {offsets = [0, 0], sizes = [8, 32], strides = [1, 1]} : vector<8x64xf32> to vector<8x32xf32>
    %77 = vector.extract_strided_slice %75 {offsets = [0, 32], sizes = [8, 32], strides = [1, 1]} : vector<8x64xf32> to vector<8x32xf32>
    %78 = vector.extract_strided_slice %66 {offsets = [0, 64], sizes = [8, 32], strides = [1, 1]} : vector<8x96xf32> to vector<8x32xf32>
    %79 = vector.extract_strided_slice %67 {offsets = [0, 64], sizes = [8, 32], strides = [1, 1]} : vector<8x96xf32> to vector<8x32xf32>
    %80 = arith.mulf %76, %79 : vector<8x32xf32>
    %81 = arith.addf %78, %80 : vector<8x32xf32>
    %82 = math.tanh %81 : vector<8x32xf32>
    %83 = arith.subf %65, %82 : vector<8x32xf32>
    %84 = arith.mulf %77, %83 : vector<8x32xf32>
    %85 = arith.addf %82, %84 : vector<8x32xf32>
    %86 = vector.extract_strided_slice %2 {offsets = [32, 0], sizes = [8, 96], strides = [1, 1]} : vector<64x96xf32> to vector<8x96xf32>
    %cst_16 = arith.constant dense<0.000000e+00> : vector<8x96xf32>
    %87 = tpu.matmul %85, %3, %cst_16 {dimension_numbers = #tpu.dot_dimension_numbers<[1], [0], [0], [1], [0, 0, 1, 1], [], []>} : vector<8x32xf32>, vector<32x96xf32>, vector<8x96xf32> -> vector<8x96xf32>
    %88 = vector.extract_strided_slice %86 {offsets = [0, 0], sizes = [8, 64], strides = [1, 1]} : vector<8x96xf32> to vector<8x64xf32>
    %89 = vector.extract_strided_slice %87 {offsets = [0, 0], sizes = [8, 64], strides = [1, 1]} : vector<8x96xf32> to vector<8x64xf32>
    %90 = arith.addf %88, %89 : vector<8x64xf32>
    %91 = arith.negf %90 : vector<8x64xf32>
    %92 = math.exp %91 : vector<8x64xf32>
    %cst_17 = arith.constant 1.000000e+00 : f32
    %93 = vector.broadcast %cst_17 : f32 to vector<8x64xf32>
    %94 = arith.addf %93, %92 : vector<8x64xf32>
    %95 = arith.divf %93, %94 : vector<8x64xf32>
    %96 = vector.extract_strided_slice %95 {offsets = [0, 0], sizes = [8, 32], strides = [1, 1]} : vector<8x64xf32> to vector<8x32xf32>
    %97 = vector.extract_strided_slice %95 {offsets = [0, 32], sizes = [8, 32], strides = [1, 1]} : vector<8x64xf32> to vector<8x32xf32>
    %98 = vector.extract_strided_slice %86 {offsets = [0, 64], sizes = [8, 32], strides = [1, 1]} : vector<8x96xf32> to vector<8x32xf32>
    %99 = vector.extract_strided_slice %87 {offsets = [0, 64], sizes = [8, 32], strides = [1, 1]} : vector<8x96xf32> to vector<8x32xf32>
    %100 = arith.mulf %96, %99 : vector<8x32xf32>
    %101 = arith.addf %98, %100 : vector<8x32xf32>
    %102 = math.tanh %101 : vector<8x32xf32>
    %103 = arith.subf %85, %102 : vector<8x32xf32>
    %104 = arith.mulf %97, %103 : vector<8x32xf32>
    %105 = arith.addf %102, %104 : vector<8x32xf32>
    %106 = vector.extract_strided_slice %2 {offsets = [40, 0], sizes = [8, 96], strides = [1, 1]} : vector<64x96xf32> to vector<8x96xf32>
    %cst_18 = arith.constant dense<0.000000e+00> : vector<8x96xf32>
    %107 = tpu.matmul %105, %3, %cst_18 {dimension_numbers = #tpu.dot_dimension_numbers<[1], [0], [0], [1], [0, 0, 1, 1], [], []>} : vector<8x32xf32>, vector<32x96xf32>, vector<8x96xf32> -> vector<8x96xf32>
    %108 = vector.extract_strided_slice %106 {offsets = [0, 0], sizes = [8, 64], strides = [1, 1]} : vector<8x96xf32> to vector<8x64xf32>
    %109 = vector.extract_strided_slice %107 {offsets = [0, 0], sizes = [8, 64], strides = [1, 1]} : vector<8x96xf32> to vector<8x64xf32>
    %110 = arith.addf %108, %109 : vector<8x64xf32>
    %111 = arith.negf %110 : vector<8x64xf32>
    %112 = math.exp %111 : vector<8x64xf32>
    %cst_19 = arith.constant 1.000000e+00 : f32
    %113 = vector.broadcast %cst_19 : f32 to vector<8x64xf32>
    %114 = arith.addf %113, %112 : vector<8x64xf32>
    %115 = arith.divf %113, %114 : vector<8x64xf32>
    %116 = vector.extract_strided_slice %115 {offsets = [0, 0], sizes = [8, 32], strides = [1, 1]} : vector<8x64xf32> to vector<8x32xf32>
    %117 = vector.extract_strided_slice %115 {offsets = [0, 32], sizes = [8, 32], strides = [1, 1]} : vector<8x64xf32> to vector<8x32xf32>
    %118 = vector.extract_strided_slice %106 {offsets = [0, 64], sizes = [8, 32], strides = [1, 1]} : vector<8x96xf32> to vector<8x32xf32>
    %119 = vector.extract_strided_slice %107 {offsets = [0, 64], sizes = [8, 32], strides = [1, 1]} : vector<8x96xf32> to vector<8x32xf32>
    %120 = arith.mulf %116, %119 : vector<8x32xf32>
    %121 = arith.addf %118, %120 : vector<8x32xf32>
    %122 = math.tanh %121 : vector<8x32xf32>
    %123 = arith.subf %105, %122 : vector<8x32xf32>
    %124 = arith.mulf %117, %123 : vector<8x32xf32>
    %125 = arith.addf %122, %124 : vector<8x32xf32>
    %126 = vector.extract_strided_slice %2 {offsets = [48, 0], sizes = [8, 96], strides = [1, 1]} : vector<64x96xf32> to vector<8x96xf32>
    %cst_20 = arith.constant dense<0.000000e+00> : vector<8x96xf32>
    %127 = tpu.matmul %125, %3, %cst_20 {dimension_numbers = #tpu.dot_dimension_numbers<[1], [0], [0], [1], [0, 0, 1, 1], [], []>} : vector<8x32xf32>, vector<32x96xf32>, vector<8x96xf32> -> vector<8x96xf32>
    %128 = vector.extract_strided_slice %126 {offsets = [0, 0], sizes = [8, 64], strides = [1, 1]} : vector<8x96xf32> to vector<8x64xf32>
    %129 = vector.extract_strided_slice %127 {offsets = [0, 0], sizes = [8, 64], strides = [1, 1]} : vector<8x96xf32> to vector<8x64xf32>
    %130 = arith.addf %128, %129 : vector<8x64xf32>
    %131 = arith.negf %130 : vector<8x64xf32>
    %132 = math.exp %131 : vector<8x64xf32>
    %cst_21 = arith.constant 1.000000e+00 : f32
    %133 = vector.broadcast %cst_21 : f32 to vector<8x64xf32>
    %134 = arith.addf %133, %132 : vector<8x64xf32>
    %135 = arith.divf %133, %134 : vector<8x64xf32>
    %136 = vector.extract_strided_slice %135 {offsets = [0, 0], sizes = [8, 32], strides = [1, 1]} : vector<8x64xf32> to vector<8x32xf32>
    %137 = vector.extract_strided_slice %135 {offsets = [0, 32], sizes = [8, 32], strides = [1, 1]} : vector<8x64xf32> to vector<8x32xf32>
    %138 = vector.extract_strided_slice %126 {offsets = [0, 64], sizes = [8, 32], strides = [1, 1]} : vector<8x96xf32> to vector<8x32xf32>
    %139 = vector.extract_strided_slice %127 {offsets = [0, 64], sizes = [8, 32], strides = [1, 1]} : vector<8x96xf32> to vector<8x32xf32>
    %140 = arith.mulf %136, %139 : vector<8x32xf32>
    %141 = arith.addf %138, %140 : vector<8x32xf32>
    %142 = math.tanh %141 : vector<8x32xf32>
    %143 = arith.subf %125, %142 : vector<8x32xf32>
    %144 = arith.mulf %137, %143 : vector<8x32xf32>
    %145 = arith.addf %142, %144 : vector<8x32xf32>
    %146 = vector.extract_strided_slice %2 {offsets = [56, 0], sizes = [8, 96], strides = [1, 1]} : vector<64x96xf32> to vector<8x96xf32>
    %cst_22 = arith.constant dense<0.000000e+00> : vector<8x96xf32>
    %147 = tpu.matmul %145, %3, %cst_22 {dimension_numbers = #tpu.dot_dimension_numbers<[1], [0], [0], [1], [0, 0, 1, 1], [], []>} : vector<8x32xf32>, vector<32x96xf32>, vector<8x96xf32> -> vector<8x96xf32>
    %148 = vector.extract_strided_slice %146 {offsets = [0, 0], sizes = [8, 64], strides = [1, 1]} : vector<8x96xf32> to vector<8x64xf32>
    %149 = vector.extract_strided_slice %147 {offsets = [0, 0], sizes = [8, 64], strides = [1, 1]} : vector<8x96xf32> to vector<8x64xf32>
    %150 = arith.addf %148, %149 : vector<8x64xf32>
    %151 = arith.negf %150 : vector<8x64xf32>
    %152 = math.exp %151 : vector<8x64xf32>
    %cst_23 = arith.constant 1.000000e+00 : f32
    %153 = vector.broadcast %cst_23 : f32 to vector<8x64xf32>
    %154 = arith.addf %153, %152 : vector<8x64xf32>
    %155 = arith.divf %153, %154 : vector<8x64xf32>
    %156 = vector.extract_strided_slice %155 {offsets = [0, 0], sizes = [8, 32], strides = [1, 1]} : vector<8x64xf32> to vector<8x32xf32>
    %157 = vector.extract_strided_slice %155 {offsets = [0, 32], sizes = [8, 32], strides = [1, 1]} : vector<8x64xf32> to vector<8x32xf32>
    %158 = vector.extract_strided_slice %146 {offsets = [0, 64], sizes = [8, 32], strides = [1, 1]} : vector<8x96xf32> to vector<8x32xf32>
    %159 = vector.extract_strided_slice %147 {offsets = [0, 64], sizes = [8, 32], strides = [1, 1]} : vector<8x96xf32> to vector<8x32xf32>
    %160 = arith.mulf %156, %159 : vector<8x32xf32>
    %161 = arith.addf %158, %160 : vector<8x32xf32>
    %162 = math.tanh %161 : vector<8x32xf32>
    %163 = arith.subf %145, %162 : vector<8x32xf32>
    %164 = arith.mulf %157, %163 : vector<8x32xf32>
    %165 = arith.addf %162, %164 : vector<8x32xf32>
    %166 = vector.shape_cast %165 : vector<8x32xf32> to vector<1x8x32xf32>
    %c0_24 = arith.constant 0 : index
    %c0_25 = arith.constant 0 : index
    %c0_26 = arith.constant 0 : index
    %167 = vector.load %arg4[%c0_24, %c0_25, %c0_26] : memref<1x8x32xf32, #tpu.memory_space<vmem>>, vector<1x8x32xf32>
    tpu.vector_store %arg4[%c0_24, %c0_25, %c0_26], %166 {strides = array<i32>} : memref<1x8x32xf32, #tpu.memory_space<vmem>>, vector<1x8x32xf32>,
    return
  }
}

</mosaic_0001>

<bundles_post_ra>
// kernel: tpu_custom_call.1
= control target key start
LH: loop header
LB: loop body
LE: loop exit
PB: predicated region body
PF: predicated region fallthrough
CT: control target
= control target key end

     0   :  { %v1337_v3 = vmov 0.0|0.0   ;;  %vm1338_vm0 = vmmov 0   ;;  %v1339_v8 = vmov 0.0   ;;  %vm30_vm1 = vcmask 261120   ;;  %s1558_s0 = inlined_call_operand.vmem [shape: f32[64,32], index: 0, kind: input, shape index: {}]   ;;  %s1559_s1 = inlined_call_operand.vmem [shape: f32[32,96], index: 1, kind: input, shape index: {}]   ;;  %s1560_s2 = inlined_call_operand.vmem [shape: f32[32,96], index: 2, kind: input, shape index: {}]   ;;  %s1561_s3 = inlined_call_operand.vmem [shape: f32[1,8,32], index: 3, kind: input, shape index: {}]   ;;  %s1562_s4 = inlined_call_operand.hbm [shape: f32[1,8,32], index: 4, kind: output, shape index: {}]  }
   0x1   :  { %v26_v0 = vld [vmem:[%s1559_s1] sm:$0xff]  ;;  %v27_v1 = vld [vmem:[%s1559_s1 + $0x8] sm:$0xff]  ;;  %1210 = vmatprep.subr.bf16.mxu1 %v1337_v3  ;;  %v28_v6 = vld [vmem:[%s1559_s1 + $0x10] sm:$0xff]  ;;  %1122 = vmatprep.mubr.msk.f32.mxu1 %vm1338_vm0, %v1339_v8 }
   0x2   :  { %v160_v2 = vld [vmem:[%s1560_s2] sm:$0xff]  ;;  %v1202_v4 = vpack.c.bf16 %v27_v1, %v26_v0  ;;  %v161_v5 = vld [vmem:[%s1560_s2 + $0x8] sm:$0xff]  ;;  %v29_v7 = vld [vmem:[%s1559_s1 + $0x18] sm:$0xff] }
   0x3   :  { %v1390_v9 = vpack.c.bf16 %v161_v5, %v160_v2  ;;  %v1206_v10 = vpack.c.bf16 %v29_v7, %v28_v6  ;;  %v162_v11 = vld [vmem:[%s1560_s2 + $0x10] sm:$0xff]  ;;  %v163_v12 = vld [vmem:[%s1560_s2 + $0x18] sm:$0xff]  ;;  %v18_v13 = vld [vmem:[%s1558_s0] sm:$0xff] }
   0x4   :  { %1203 = vmatprep.subr.bf16.mxu0 %v1202_v4  ;;  %1102 = vmatprep.mubr.msk.f32.mxu0 %vm30_vm1, %v18_v13 }
   0x5   :  { %9 = vsyncpa [#allocation3], 0  ;;  %1212 = vmatpush3.bf16.msra.mxu1 %v1390_v9  ;;  %1205 = vmatpush3.bf16.msra.mxu0 %v1202_v4  ;;  %v1403_v14 = vpack.c.bf16 %v163_v12, %v162_v11  ;;  %v164_v15 = vld [vmem:[%s1561_s3] sm:$0xff]  ;;  %v19_v16 = vld [vmem:[%s1558_s0 + $0x8] sm:$0xff]  ;;  %s1340_s3 = smov 64   ;;  %s1341_s9 = smov 32  }
   0x6   :  { %1213 = vmatprep.subr.bf16.mxu1 %v1337_v3  ;;  %1207 = vmatprep.subr.bf16.mxu0 %v1206_v10  ;;  %s1342_s10 = smov 96   ;;  %v20_v51 = vld [vmem:[%s1558_s0 + $0x10] sm:$0xff]  ;;  %v21_v52 = vld [vmem:[%s1558_s0 + $0x18] sm:$0xff]  ;;  %v22_v53 = vld [vmem:[%s1558_s0 + $0x20] sm:$0xff] }
   0x7   :  { %v23_v54 = vld [vmem:[%s1558_s0 + $0x28] sm:$0xff]  ;;  %v24_v55 = vld [vmem:[%s1558_s0 + $0x30] sm:$0xff]  ;;  %v25_v56 = vld [vmem:[%s1558_s0 + $0x38] sm:$0xff]  ;;  %s1343_s0 = smov [#allocation2]  }
   0x8   :  { %s1010_s23 = sshll.u32 %s1343_s0, 4  ;;  %s1011_s23 = int_to_ptr.vmem [resolvable:$true] %s1010_s23 }
   0x9   :  { %1215 = vmatpush3.bf16.msra.mxu1 %v1403_v14  ;;  %1209 = vmatpush3.bf16.msra.mxu0 %v1206_v10  ;;  %s1313_s24 = scalar_lea.vmem %s1011_s23, 128  ;;  %p1318_p1 = scmp.lt.s32.totalorder %s1011_s23, %s1011_s23 }
   0xa   :  { %1216 = vmatprep.subr.bf16.mxu1 %v1337_v3  ;;  %1222 = vmatprep.subr.bf16.mxu0 %v1337_v3  ;;  %p1314_p0 = scmp.ne.s32.totalorder %s1011_s23, %s1313_s24  ;;  %p1319_p2 = scmp.lt.s32.totalorder %s1313_s24, %s1313_s24 }
   0xc   :  { %1123 = vmatmul.mubr.msk.f32.vlgmr.msra.gmra.mrb[0].mxu1 %vm30_vm1, %v164_v15  ;;  %1103 = vmatmul.mubr.msk.f32.vlgmr.msra.gmra.mrb[0].mxu0 %vm30_vm1, %v19_v16  ;;  %p1320_p3 = por %p1319_p2, %p1318_p1 }
   0xd   :  { %1218 = vmatpush3.bf16.msra.mxu1 %v1390_v9  ;;  %1133 = vmatprep.mubr.msk.f32.mxu1 %vm1338_vm0, %v1339_v8 }
   0xe   :  { %1219 = vmatprep.subr.bf16.mxu1 %v1337_v3  ;;  %1224 = vmatpush3.bf16.msra.mxu0 %v1390_v9  ;;  %p1321_p4 = pnand %p1320_p3, %p1314_p0 }
   0xf   :  { %1225 = vmatprep.subr.bf16.mxu0 %v1337_v3  ;;  %1105 = vmatprep.mubr.msk.f32.mxu0 %vm30_vm1, %v20_v51 }
  0x10   :  { %1106 = vmatmul.mubr.msk.f32.gmra.mrb[2].mxu0 %vm30_vm1, %v21_v52 }
  0x11   :  { %1221 = vmatpush3.bf16.msra.mxu1 %v1403_v14  ;;  %1108 = vmatprep.mubr.msk.f32.mxu0 %vm30_vm1, %v22_v53 }
  0x12   :  { %1227 = vmatpush3.bf16.msra.mxu0 %v1403_v14  ;;  %1228 = vmatprep.subr.bf16.mxu1 %v1337_v3 }
  0x13   :  { %1234 = vmatprep.subr.bf16.mxu0 %v1337_v3 }
  0x14   :  { %1109 = vmatmul.mubr.msk.f32.gmra.mrb[4].mxu0 %vm30_vm1, %v23_v54 }
  0x15   :  { %1111 = vmatprep.mubr.msk.f32.mxu0 %vm30_vm1, %v24_v55 }
  0x18   :  { %1112 = vmatmul.mubr.msk.f32.gmra.mrb[6].mxu0 %vm30_vm1, %v25_v56 }
  0x19   :  { %1144 = vmatprep.mubr.msk.f32.mxu0 %vm1338_vm0, %v1339_v8 }
  0xdf   :  { %v234_v17 = vpop.f32.mrb[0].mxu1  ;;  %v1104_v18 = vpop.f32.mrb[0].mxu0 }
  0xe0   :  { %246 = vrot.lane.b32.xlu0 %v234_v17, %s1340_s3  ;;  %v1124_v19 = vpop.f32.mrb[1].mxu1  ;;  %v121_v20 = vpop.f32.mrb[1].mxu0 }
  0xe1   :  { %v238_v21 = vadd.f32 %v234_v17, %v121_v20 }
  0xe3   :  { %v1027_v22 = vmul.f32 -1.442695, %v238_v21  ;;  %v1107_v61 = vpop.f32.mrb[2].mxu0 }
  0xe4   :  { %v131_v62 = vpop.f32.mrb[3].mxu0 }
  0xe5   :  { %1265 = vpow2.f32 %v1027_v22 }
  0xe7   :  { %v1471_v63 = vpop.f32.mrb[4].mxu0 }
  0xe8   :  { %v1473_v0 = vpop.f32.mrb[5].mxu0 }
  0xeb   :  { %v1475_v1 = vpop.f32.mrb[6].mxu0 }
  0xec   :  { %v1477_v2 = vpop.f32.mrb[7].mxu0 }
  0xef   :  { %v1266_v23 = vpop.eup %1265 }
  0xf0   :  { %v242_v24 = vadd.f32 1.0, %v1266_v23 }
  0xf2   :  { %1267 = vrcp.f32 %v242_v24 }
  0xfc   :  { %v1268_v25 = vpop.eup %1267 }
 0x152   :  { %v247_v26 = vpop.permute.xlu0 %246 }
 0x153   :  { %v249_v27 = vmul.f32 %v1268_v25, %v247_v26 }
 0x155   :  { %251 = vrot.lane.b32.xlu0 %v249_v27, %s1340_s3 }
 0x1c7   :  { %v252_v28 = vpop.permute.xlu0 %251 }
 0x1c8   :  { %v254_v29 = vadd.f32 %v252_v28, %v121_v20 }
 0x1ca   :  { %1269 = vtanh.f32 %v254_v29 }
 0x1d4   :  { %v1270_v30 = vpop.eup %1269 }
 0x1d5   :  { %257 = vrot.lane.b32.xlu1 %v1270_v30, %s1340_s3 }
 0x247   :  { %v258_v31 = vpop.permute.xlu1 %257 }
 0x248   :  { %v260_v32 = vsub.f32 %v164_v15, %v258_v31 }
 0x24a   :  { %262 = vrot.lane.b32.xlu1 %v260_v32, %s1341_s9 }
 0x2bc   :  { %v263_v33 = vpop.permute.xlu1 %262 }
 0x2bd   :  { %v265_v34 = vmul.f32 %v1268_v25, %v263_v33 }
 0x2bf   :  { %267 = vrot.lane.b32.xlu0 %v265_v34, %s1341_s9 }
 0x331   :  { %v268_v35 = vpop.permute.xlu0 %267 }
 0x332   :  { %v270_v36 = vadd.f32 %v1270_v30, %v268_v35 }
 0x334   :  { %272 = vrot.lane.b32.xlu1 %v270_v36, %s1340_s3 }
 0x3a6   :  { %v273_v37 = vpop.permute.xlu1 %272 }
 0x3a7   :  { %1134 = vmatmul.mubr.msk.f32.vlgmr.msra.gmra.mrb[2].mxu1 %vm30_vm1, %v273_v37 }
 0x3a8   :  { %1230 = vmatpush3.bf16.msra.mxu1 %v1390_v9  ;;  %1155 = vmatprep.mubr.msk.f32.mxu1 %vm1338_vm0, %v1339_v8 }
 0x3a9   :  { %1231 = vmatprep.subr.bf16.mxu1 %v1337_v3 }
 0x3ac   :  { %1233 = vmatpush3.bf16.msra.mxu1 %v1403_v14 }
 0x3ad   :  { %1240 = vmatprep.subr.bf16.mxu1 %v1337_v3 }
 0x47a   :  { %v342_v38 = vpop.f32.mrb[2].mxu1 }
 0x47b   :  { %v346_v39 = vadd.f32 %v1104_v18, %v342_v38  ;;  %354 = vrot.lane.b32.xlu0 %v342_v38, %s1340_s3  ;;  %v1135_v40 = vpop.f32.mrb[3].mxu1 }
 0x47d   :  { %v1029_v41 = vmul.f32 -1.442695, %v346_v39 }
 0x47f   :  { %1271 = vpow2.f32 %v1029_v41 }
 0x489   :  { %v1272_v42 = vpop.eup %1271 }
 0x48a   :  { %v350_v43 = vadd.f32 1.0, %v1272_v42 }
 0x48c   :  { %1273 = vrcp.f32 %v350_v43 }
 0x496   :  { %v1274_v44 = vpop.eup %1273 }
 0x4ed   :  { %v355_v45 = vpop.permute.xlu0 %354 }
 0x4ee   :  { %v357_v46 = vmul.f32 %v1274_v44, %v355_v45 }
 0x4f0   :  { %359 = vrot.lane.b32.xlu1 %v357_v46, %s1340_s3 }
 0x562   :  { %v360_v47 = vpop.permute.xlu1 %359 }
 0x563   :  { %v362_v48 = vadd.f32 %v1104_v18, %v360_v47 }
 0x565   :  { %1275 = vtanh.f32 %v362_v48 }
 0x56f   :  { %v1276_v49 = vpop.eup %1275 }
 0x570   :  { %v364_v50 = vsub.f32 %v270_v36, %v1276_v49 }
 0x572   :  { %366 = vrot.lane.b32.xlu0 %v364_v50, %s1342_s10 }
 0x5e4   :  { %v367_v57 = vpop.permute.xlu0 %366 }
 0x5e5   :  { %v369_v58 = vmul.f32 %v1274_v44, %v367_v57 }
 0x5e7   :  { %371 = vrot.lane.b32.xlu1 %v369_v58, %s1341_s9 }
 0x659   :  { %v372_v59 = vpop.permute.xlu1 %371 }
 0x65a   :  { %v374_v60 = vadd.f32 %v1276_v49, %v372_v59 }
 0x65c   :  { %376 = vrot.lane.b32.xlu0 %v374_v60, %s1340_s3 }
 0x6ce   :  { %v377_v4 = vpop.permute.xlu0 %376 }
 0x6cf   :  { %1145 = vmatmul.mubr.msk.f32.vlgmr.msra.gmra.mrb[8].mxu0 %vm30_vm1, %v377_v4 }
 0x6d0   :  { %1236 = vmatpush3.bf16.msra.mxu0 %v1390_v9  ;;  %1166 = vmatprep.mubr.msk.f32.mxu0 %vm1338_vm0, %v1339_v8 }
 0x6d1   :  { %1237 = vmatprep.subr.bf16.mxu0 %v1337_v3 }
 0x6d4   :  { %1239 = vmatpush3.bf16.msra.mxu0 %v1403_v14 }
 0x6d5   :  { %1246 = vmatprep.subr.bf16.mxu0 %v1337_v3 }
 0x7a2   :  { %v446_v5 = vpop.f32.mrb[8].mxu0 }
 0x7a3   :  { %v450_v6 = vadd.f32 %v446_v5, %v131_v62  ;;  %458 = vrot.lane.b32.xlu1 %v446_v5, %s1340_s3  ;;  %v1146_v7 = vpop.f32.mrb[9].mxu0 }
 0x7a5   :  { %v1031_v10 = vmul.f32 -1.442695, %v450_v6 }
 0x7a7   :  { %1277 = vpow2.f32 %v1031_v10 }
 0x7b1   :  { %v1278_v11 = vpop.eup %1277 }
 0x7b2   :  { %v454_v12 = vadd.f32 1.0, %v1278_v11 }
 0x7b4   :  { %1279 = vrcp.f32 %v454_v12 }
 0x7be   :  { %v1280_v13 = vpop.eup %1279 }
 0x815   :  { %v459_v15 = vpop.permute.xlu1 %458 }
 0x816   :  { %v461_v16 = vmul.f32 %v1280_v13, %v459_v15 }
 0x818   :  { %463 = vrot.lane.b32.xlu0 %v461_v16, %s1340_s3 }
 0x88a   :  { %v464_v17 = vpop.permute.xlu0 %463 }
 0x88b   :  { %v466_v18 = vadd.f32 %v464_v17, %v131_v62 }
 0x88d   :  { %1281 = vtanh.f32 %v466_v18 }
 0x897   :  { %v1282_v19 = vpop.eup %1281 }
 0x898   :  { %v468_v20 = vsub.f32 %v374_v60, %v1282_v19 }
 0x89a   :  { %470 = vrot.lane.b32.xlu1 %v468_v20, %s1342_s10 }
 0x90c   :  { %v471_v21 = vpop.permute.xlu1 %470 }
 0x90d   :  { %v473_v22 = vmul.f32 %v1280_v13, %v471_v21 }
 0x90f   :  { %475 = vrot.lane.b32.xlu0 %v473_v22, %s1341_s9 }
 0x981   :  { %v476_v23 = vpop.permute.xlu0 %475 }
 0x982   :  { %v478_v24 = vadd.f32 %v1282_v19, %v476_v23 }
 0x984   :  { %480 = vrot.lane.b32.xlu1 %v478_v24, %s1340_s3 }
 0x9f6   :  { %v481_v25 = vpop.permute.xlu1 %480 }
 0x9f7   :  { %1156 = vmatmul.mubr.msk.f32.vlgmr.msra.gmra.mrb[4].mxu1 %vm30_vm1, %v481_v25 }
 0x9f8   :  { %1242 = vmatpush3.bf16.msra.mxu1 %v1390_v9  ;;  %1177 = vmatprep.mubr.msk.f32.mxu1 %vm1338_vm0, %v1339_v8 }
 0x9f9   :  { %1243 = vmatprep.subr.bf16.mxu1 %v1337_v3 }
 0x9fc   :  { %1245 = vmatpush3.bf16.msra.mxu1 %v1403_v14 }
 0x9fd   :  { %1252 = vmatprep.subr.bf16.mxu1 %v1337_v3 }
 0xaca   :  { %v550_v26 = vpop.f32.mrb[4].mxu1 }
 0xacb   :  { %v554_v27 = vadd.f32 %v1107_v61, %v550_v26  ;;  %562 = vrot.lane.b32.xlu0 %v550_v26, %s1340_s3  ;;  %v1157_v28 = vpop.f32.mrb[5].mxu1 }
 0xacd   :  { %v1033_v29 = vmul.f32 -1.442695, %v554_v27 }
 0xacf   :  { %1283 = vpow2.f32 %v1033_v29 }
 0xad9   :  { %v1284_v30 = vpop.eup %1283 }
 0xada   :  { %v558_v31 = vadd.f32 1.0, %v1284_v30 }
 0xadc   :  { %1285 = vrcp.f32 %v558_v31 }
 0xae6   :  { %v1286_v32 = vpop.eup %1285 }
 0xb3d   :  { %v563_v33 = vpop.permute.xlu0 %562 }
 0xb3e   :  { %v565_v34 = vmul.f32 %v1286_v32, %v563_v33 }
 0xb40   :  { %567 = vrot.lane.b32.xlu1 %v565_v34, %s1340_s3 }
 0xbb2   :  { %v568_v35 = vpop.permute.xlu1 %567 }
 0xbb3   :  { %v570_v36 = vadd.f32 %v1107_v61, %v568_v35 }
 0xbb5   :  { %1287 = vtanh.f32 %v570_v36 }
 0xbbf   :  { %v1288_v37 = vpop.eup %1287 }
 0xbc0   :  { %v572_v38 = vsub.f32 %v478_v24, %v1288_v37 }
 0xbc2   :  { %574 = vrot.lane.b32.xlu0 %v572_v38, %s1342_s10 }
 0xc34   :  { %v575_v39 = vpop.permute.xlu0 %574 }
 0xc35   :  { %v577_v40 = vmul.f32 %v1286_v32, %v575_v39 }
 0xc37   :  { %579 = vrot.lane.b32.xlu1 %v577_v40, %s1341_s9 }
 0xca9   :  { %v580_v41 = vpop.permute.xlu1 %579 }
 0xcaa   :  { %v582_v42 = vadd.f32 %v1288_v37, %v580_v41 }
 0xcac   :  { %584 = vrot.lane.b32.xlu0 %v582_v42, %s1340_s3 }
 0xd1e   :  { %v585_v43 = vpop.permute.xlu0 %584 }
 0xd1f   :  { %1167 = vmatmul.mubr.msk.f32.vlgmr.msra.gmra.mrb[10].mxu0 %vm30_vm1, %v585_v43 }
 0xd20   :  { %1248 = vmatpush3.bf16.msra.mxu0 %v1390_v9  ;;  %1188 = vmatprep.mubr.msk.f32.mxu0 %vm1338_vm0, %v1339_v8 }
 0xd21   :  { %1249 = vmatprep.subr.bf16.mxu0 %v1337_v3 }
 0xd24   :  { %1251 = vmatpush3.bf16.msra.mxu0 %v1403_v14 }
 0xdf2   :  { %v654_v44 = vpop.f32.mrb[10].mxu0 }
 0xdf3   :  { %v658_v45 = vadd.f32 %v654_v44, %v1473_v0  ;;  %666 = vrot.lane.b32.xlu1 %v654_v44, %s1340_s3  ;;  %v1168_v46 = vpop.f32.mrb[11].mxu0 }
 0xdf5   :  { %v1035_v47 = vmul.f32 -1.442695, %v658_v45 }
 0xdf7   :  { %1289 = vpow2.f32 %v1035_v47 }
 0xe01   :  { %v1290_v48 = vpop.eup %1289 }
 0xe02   :  { %v662_v49 = vadd.f32 1.0, %v1290_v48 }
 0xe04   :  { %1291 = vrcp.f32 %v662_v49 }
 0xe0e   :  { %v1292_v50 = vpop.eup %1291 }
 0xe65   :  { %v667_v51 = vpop.permute.xlu1 %666 }
 0xe66   :  { %v669_v52 = vmul.f32 %v1292_v50, %v667_v51 }
 0xe68   :  { %671 = vrot.lane.b32.xlu0 %v669_v52, %s1340_s3 }
 0xeda   :  { %v672_v53 = vpop.permute.xlu0 %671 }
 0xedb   :  { %v674_v54 = vadd.f32 %v672_v53, %v1473_v0 }
 0xedd   :  { %1293 = vtanh.f32 %v674_v54 }
 0xee7   :  { %v1294_v55 = vpop.eup %1293 }
 0xee8   :  { %v676_v56 = vsub.f32 %v582_v42, %v1294_v55 }
 0xeea   :  { %678 = vrot.lane.b32.xlu1 %v676_v56, %s1342_s10 }
 0xf5c   :  { %v679_v57 = vpop.permute.xlu1 %678 }
 0xf5d   :  { %v681_v58 = vmul.f32 %v1292_v50, %v679_v57 }
 0xf5f   :  { %683 = vrot.lane.b32.xlu0 %v681_v58, %s1341_s9 }
 0xfd1   :  { %v684_v59 = vpop.permute.xlu0 %683 }
 0xfd2   :  { %v686_v60 = vadd.f32 %v1294_v55, %v684_v59 }
 0xfd4   :  { %688 = vrot.lane.b32.xlu1 %v686_v60, %s1340_s3 }
0x1046   :  { %v689_v61 = vpop.permute.xlu1 %688 }
0x1047   :  { %1178 = vmatmul.mubr.msk.f32.vlgmr.msra.gmra.mrb[6].mxu1 %vm30_vm1, %v689_v61 }
0x1048   :  { %1254 = vmatpush3.bf16.msra.mxu1 %v1390_v9  ;;  %1199 = vmatprep.mubr.msk.f32.mxu1 %vm1338_vm0, %v1339_v8 }
0x1049   :  { %1255 = vmatprep.subr.bf16.mxu1 %v1337_v3 }
0x104c   :  { %1257 = vmatpush3.bf16.msra.mxu1 %v1403_v14 }
0x111a   :  { %v758_v62 = vpop.f32.mrb[6].mxu1 }
0x111b   :  { %v762_v0 = vadd.f32 %v1471_v63, %v758_v62  ;;  %770 = vrot.lane.b32.xlu0 %v758_v62, %s1340_s3  ;;  %v1179_v4 = vpop.f32.mrb[7].mxu1 }
0x111d   :  { %v1037_v5 = vmul.f32 -1.442695, %v762_v0 }
0x111f   :  { %1295 = vpow2.f32 %v1037_v5 }
0x1129   :  { %v1296_v6 = vpop.eup %1295 }
0x112a   :  { %v766_v7 = vadd.f32 1.0, %v1296_v6 }
0x112c   :  { %1297 = vrcp.f32 %v766_v7 }
0x1136   :  { %v1298_v10 = vpop.eup %1297 }
0x118d   :  { %v771_v9 = vpop.permute.xlu0 %770 }
0x118e   :  { %v773_v11 = vmul.f32 %v1298_v10, %v771_v9 }
0x1190   :  { %775 = vrot.lane.b32.xlu1 %v773_v11, %s1340_s3 }
0x1202   :  { %v776_v8 = vpop.permute.xlu1 %775 }
0x1203   :  { %v778_v3 = vadd.f32 %v1471_v63, %v776_v8 }
0x1205   :  { %1299 = vtanh.f32 %v778_v3 }
0x120f   :  { %v1300_v14 = vpop.eup %1299 }
0x1210   :  { %v780_v12 = vsub.f32 %v686_v60, %v1300_v14 }
0x1212   :  { %782 = vrot.lane.b32.xlu0 %v780_v12, %s1342_s10 }
0x1284   :  { %v783_v13 = vpop.permute.xlu0 %782 }
0x1285   :  { %v785_v15 = vmul.f32 %v1298_v10, %v783_v13 }
0x1287   :  { %787 = vrot.lane.b32.xlu1 %v785_v15, %s1341_s9 }
0x12f9   :  { %v788_v16 = vpop.permute.xlu1 %787 }
0x12fa   :  { %v790_v17 = vadd.f32 %v1300_v14, %v788_v16 }
0x12fc   :  { %792 = vrot.lane.b32.xlu0 %v790_v17, %s1340_s3 }
0x136e   :  { %v793_v18 = vpop.permute.xlu0 %792 }
0x136f   :  { %1189 = vmatmul.mubr.msk.f32.vlgmr.msra.gmra.mrb[12].mxu0 %vm30_vm1, %v793_v18 }
0x1442   :  { %v862_v19 = vpop.f32.mrb[12].mxu0 }
0x1443   :  { %v866_v20 = vadd.f32 %v862_v19, %v1477_v2  ;;  %874 = vrot.lane.b32.xlu1 %v862_v19, %s1340_s3  ;;  %v1190_v63 = vpop.f32.mrb[13].mxu0 }
0x1445   :  { %v1039_v21 = vmul.f32 -1.442695, %v866_v20 }
0x1447   :  { %1301 = vpow2.f32 %v1039_v21 }
0x1451   :  { %v1302_v22 = vpop.eup %1301 }
0x1452   :  { %v870_v23 = vadd.f32 1.0, %v1302_v22 }
0x1454   :  { %1303 = vrcp.f32 %v870_v23 }
0x145e   :  { %v1304_v24 = vpop.eup %1303 }
0x14b5   :  { %v875_v25 = vpop.permute.xlu1 %874 }
0x14b6   :  { %v877_v26 = vmul.f32 %v1304_v24, %v875_v25 }
0x14b8   :  { %879 = vrot.lane.b32.xlu0 %v877_v26, %s1340_s3 }
0x152a   :  { %v880_v27 = vpop.permute.xlu0 %879 }
0x152b   :  { %v882_v28 = vadd.f32 %v880_v27, %v1477_v2 }
0x152d   :  { %1305 = vtanh.f32 %v882_v28 }
0x1537   :  { %v1306_v29 = vpop.eup %1305 }
0x1538   :  { %v884_v30 = vsub.f32 %v790_v17, %v1306_v29 }
0x153a   :  { %886 = vrot.lane.b32.xlu1 %v884_v30, %s1342_s10 }
0x15ac   :  { %v887_v31 = vpop.permute.xlu1 %886 }
0x15ad   :  { %v889_v32 = vmul.f32 %v1304_v24, %v887_v31 }
0x15af   :  { %891 = vrot.lane.b32.xlu0 %v889_v32, %s1341_s9 }
0x1621   :  { %v892_v33 = vpop.permute.xlu0 %891 }
0x1622   :  { %v894_v34 = vadd.f32 %v1306_v29, %v892_v33 }
0x1624   :  { %896 = vrot.lane.b32.xlu1 %v894_v34, %s1340_s3 }
0x1696   :  { %v897_v35 = vpop.permute.xlu1 %896 }
0x1697   :  { %1200 = vmatmul.mubr.msk.f32.vlgmr.msra.gmra.mrb[8].mxu1 %vm30_vm1, %v897_v35 }
0x176a   :  { %v966_v36 = vpop.f32.mrb[8].mxu1 }
0x176b   :  { %v970_v37 = vadd.f32 %v1475_v1, %v966_v36  ;;  %978 = vrot.lane.b32.xlu0 %v966_v36, %s1340_s3  ;;  %v1201_v2 = vpop.f32.mrb[9].mxu1 }
0x176d   :  { %v1041_v38 = vmul.f32 -1.442695, %v970_v37 }
0x176f   :  { %1307 = vpow2.f32 %v1041_v38 }
0x1779   :  { %v1308_v39 = vpop.eup %1307 }
0x177a   :  { %v974_v40 = vadd.f32 1.0, %v1308_v39 }
0x177c   :  { %1309 = vrcp.f32 %v974_v40 }
0x1786   :  { %v1310_v41 = vpop.eup %1309 }
0x17dd   :  { %v979_v42 = vpop.permute.xlu0 %978 }
0x17de   :  { %v981_v43 = vmul.f32 %v1310_v41, %v979_v42 }
0x17e0   :  { %983 = vrot.lane.b32.xlu1 %v981_v43, %s1340_s3 }
0x1852   :  { %v984_v44 = vpop.permute.xlu1 %983 }
0x1853   :  { %v986_v45 = vadd.f32 %v1475_v1, %v984_v44 }
0x1855   :  { %1311 = vtanh.f32 %v986_v45 }
0x185f   :  { %v1312_v46 = vpop.eup %1311 }
0x1860   :  { %v988_v47 = vsub.f32 %v894_v34, %v1312_v46 }
0x1862   :  { %990 = vrot.lane.b32.xlu0 %v988_v47, %s1342_s10 }
0x18d4   :  { %v991_v48 = vpop.permute.xlu0 %990 }
0x18d5   :  { %v993_v49 = vmul.f32 %v1310_v41, %v991_v48 }
0x18d7   :  { %995 = vrot.lane.b32.xlu1 %v993_v49, %s1341_s9 }
0x1949   :  { %v996_v50 = vpop.permute.xlu1 %995 }
0x194a   :  { %v998_v51 = vadd.f32 %v1312_v46, %v996_v50 }
0x194c   :  { %1000 = vrot.lane.b32.xlu0 %v998_v51, %s1340_s3 }
0x19be   :  { %v1001_v52 = vpop.permute.xlu0 %1000 }
0x19bf   :  { %1003 = vst.msk [vmem:[#allocation2] sm:$0xff] %vm30_vm1, %v1001_v52 }
0x19c0   :  { %1324 = shalt.err (!%p1321_p4)
}
0x19c1   :  { %s1325_s27 = scalar_lea.hbm %s1562_s4, 128 }
0x19c2   :  { %p1326_p5 = scmp.ne.s32.totalorder %s1562_s4, %s1325_s27  ;;  %p1329_p6 = scmp.lt.u32.totalorder %s1325_s27, %s1562_s4 }
0x19c4   :  { %p1331_p7 = pnand %p1329_p6, %p1326_p5 }
0x19c6   :  { %1334 = shalt.err (!%p1331_p7)
}
0x19c7   :  { %1013 = dma.vmem_to_hbm [thread:$0]  %s1011_s23, 128, %s1562_s4, [#allocation3]  }
0x19c8   :  { %1335 = dma.done.wait [#allocation3], 128  }
0x19c9   :  { %1336 = vsyncadd [#allocation3], 4294967168 }
0x19ca   :  { %1017 = vsyncpa [#allocation3], 1 }

</bundles_post_ra>
